<compile_context>
chip_gen: v6e
topology: v6e:2x2x1
jax: 0.10.0
libtpu: 0.0.40
codegen_flags: <defaults>
</compile_context>

<pallas_src>
import functools
import math

import jax
import jax.numpy as jnp
from jax import lax
from jax.experimental import pallas as pl
from jax.experimental.pallas import tpu as pltpu


def _router_kernel(x_ref, noise_ref, w_ref, b_ref, out_ref, idx_ref,
                   *, n_experts, top_k):
    """One grid step processes TM flattened (batch*seq) rows."""
    E = n_experts
    NEG = jnp.float32(-1e30)

    # Fused projection for both linear layers: (TM, D) @ (D, 2E) on the MXU,
    # bf16 operands, f32 accumulation.
    x = x_ref[...].astype(jnp.bfloat16)                               # (TM, D)
    proj = jnp.dot(x, w_ref[...],
                   preferred_element_type=jnp.float32) + b_ref[...]   # (TM, 2E)
    logits = proj[:, :E]                                              # (TM, E)
    noise_logits = proj[:, E:]                                        # (TM, E)

    # Numerically-stable softplus: max(z, 0) + log(1 + exp(-|z|)).
    sp = jnp.maximum(noise_logits, 0.0) + jnp.log(
        1.0 + jnp.exp(-jnp.abs(noise_logits)))
    noisy = logits + noise_ref[...] * sp                              # (TM, E)

    # Top-k by iterative argmax (top_k and E are tiny & static).
    iota = lax.broadcasted_iota(jnp.int32, noisy.shape, 1).astype(jnp.float32)
    work = noisy
    sel = jnp.zeros_like(noisy)
    idx_cols = []
    for _ in range(top_k):
        m = jnp.max(work, axis=-1, keepdims=True)                     # (TM, 1)
        # lowest index among ties (matches lax.top_k / torch tie order here)
        idx = jnp.min(jnp.where(work == m, iota, jnp.float32(E)),
                      axis=-1, keepdims=True)                         # (TM, 1)
        idx_cols.append(idx)
        hit = iota == idx
        sel = jnp.where(hit, 1.0, sel)
        work = jnp.where(hit, NEG, work)
    idx_ref[...] = jnp.concatenate(idx_cols, axis=-1).astype(jnp.int32)

    # Sparse softmax over the top-k support (off-support probability == 0).
    masked = jnp.where(sel > 0.0, noisy, NEG)
    mx = jnp.max(masked, axis=-1, keepdims=True)
    p = jnp.exp(masked - mx)
    denom = jnp.sum(p, axis=-1, keepdims=True)
    out_ref[...] = p * pl.reciprocal(denom, approx=True)


def _row_tile(M):
    """Rows per grid step: multiple of 8, prefer >= 2 grid steps (megacore)."""
    for t in (256, 128, 64, 32, 16, 8):
        if M % t == 0 and M // t >= 2:
            return t
    for t in (256, 128, 64, 32, 16, 8):
        if M % t == 0:
            return t
    return M


def noisy_topk_router_pallas(x, noise, params, *, top_k):
    """x: (B, L, D) f32; noise: (B, L, E) standard normal f32.

    Returns (router_output (B, L, E) f32, indices (B, L, top_k) int32).
    """
    B, L, D = x.shape
    E = params["w_route"].shape[1]
    M = B * L

    x2 = x.reshape(M, D)
    noise2 = noise.reshape(M, E)

    # Fuse the two linear layers into one matmul; ship weights as bf16.
    w_cat = jnp.concatenate([params["w_route"], params["w_noise"]],
                            axis=1).astype(jnp.bfloat16)              # (D, 2E)
    b_cat = jnp.concatenate([params["b_route"], params["b_noise"]],
                            axis=1).astype(jnp.float32)               # (1, 2E)

    TM = _row_tile(M)
    grid = (M // TM,)

    kernel = functools.partial(_router_kernel, n_experts=E, top_k=top_k)
    out2, idx2 = pl.pallas_call(
        kernel,
        out_shape=(jax.ShapeDtypeStruct((M, E), jnp.float32),
                   jax.ShapeDtypeStruct((M, top_k), jnp.int32)),
        grid_spec=pltpu.PrefetchScalarGridSpec(
            num_scalar_prefetch=0,
            grid=grid,
            in_specs=[
                pl.BlockSpec((TM, D), lambda i: (i, 0)),
                pl.BlockSpec((TM, E), lambda i: (i, 0)),
                pl.BlockSpec((D, 2 * E), lambda i: (0, 0)),
                pl.BlockSpec((1, 2 * E), lambda i: (0, 0)),
            ],
            out_specs=(
                pl.BlockSpec((TM, E), lambda i: (i, 0)),
                pl.BlockSpec((TM, top_k), lambda i: (i, 0)),
            ),
        ),
        compiler_params=pltpu.CompilerParams(
            dimension_semantics=("parallel",),
            vmem_limit_bytes=32 * 1024 * 1024),
    )(x2, noise2, w_cat, b_cat)

    return out2.reshape(B, L, E), idx2.reshape(B, L, top_k)


# ------------------------- pure-JAX reference (for checking) ---------------
def noisy_topk_router_ref(x, noise, params, *, top_k):
    # Same bf16 operand rounding as the kernel's MXU matmul, f32 accumulation.
    xb = x.astype(jnp.bfloat16).astype(jnp.float32)
    wr = params["w_route"].astype(jnp.bfloat16).astype(jnp.float32)
    wn = params["w_noise"].astype(jnp.bfloat16).astype(jnp.float32)
    logits = xb @ wr + params["b_route"]
    noise_logits = xb @ wn + params["b_noise"]
    noisy = logits + noise * jax.nn.softplus(noise_logits)

    top_vals, top_idx = jax.lax.top_k(noisy, top_k)
    E = noisy.shape[-1]
    support = jax.nn.one_hot(top_idx, E, dtype=jnp.float32).sum(axis=-2) > 0
    sparse = jnp.where(support, noisy, -jnp.inf)
    return jax.nn.softmax(sparse, axis=-1), top_idx


if __name__ == "__main__":
    # Small config: hid_dim D=32, seq L=8, batch B=2, n_experts E=8, top_k K=2.
    B, L, D, E, K = 2, 8, 32, 8, 2

    key = jax.random.PRNGKey(0)
    kx, kn, kw1, kw2, kb1, kb2 = jax.random.split(key, 6)

    x = jax.random.normal(kx, (B, L, D), jnp.float32)
    # Explicit standard-normal noise (stands in for torch.randn_like).
    noise = jax.random.normal(kn, (B, L, E), jnp.float32)

    params = {
        "w_route": 0.05 * jax.random.normal(kw1, (D, E), jnp.float32),
        "b_route": 0.05 * jax.random.normal(kb1, (1, E), jnp.float32),
        "w_noise": 0.05 * jax.random.normal(kw2, (D, E), jnp.float32),
        "b_noise": 0.05 * jax.random.normal(kb2, (1, E), jnp.float32),
    }

    out, idx = noisy_topk_router_pallas(x, noise, params, top_k=K)
    out, idx = jax.block_until_ready((out, idx))

    ref_out, ref_idx = noisy_topk_router_ref(x, noise, params, top_k=K)

    assert out.shape == (B, L, E) and idx.shape == (B, L, K)
    assert jnp.allclose(out, ref_out, rtol=2e-3, atol=2e-3), \
        f"max abs err {float(jnp.max(jnp.abs(out - ref_out)))}"
    assert jnp.array_equal(idx, ref_idx), "top-k indices mismatch"
    assert jnp.allclose(out.sum(-1), 1.0, atol=2e-3), "router probs must sum to 1"

    print("KERNEL_OK")
</pallas_src>

<mosaic_0001>
module attributes {stable_mosaic.version = 11 : i64} {
  func.func @_router_kernel(%arg0: i32, %arg1: memref<8x32xf32, #tpu.memory_space<vmem>>, %arg2: memref<8x8xf32, #tpu.memory_space<vmem>>, %arg3: memref<32x16xbf16, #tpu.memory_space<vmem>>, %arg4: memref<1x16xf32, #tpu.memory_space<vmem>>, %arg5: memref<8x8xf32, #tpu.memory_space<vmem>>, %arg6: memref<8x2xi32, #tpu.memory_space<vmem>>) attributes {dimension_semantics = [#tpu.dimension_semantics<parallel>], iteration_bounds = array<i64: 2>, scalar_prefetch = 0 : i64, scratch_operands = 0 : i64, tpu.core_type = #tpu.core_type<tc>, window_params = [{transform_indices = @transform_0, window_bounds = array<i64: 8, 32>}, {transform_indices = @transform_1, window_bounds = array<i64: 8, 8>}, {pipeline_mode = #tpu.pipeline_mode<synchronous>, transform_indices = @transform_2, window_bounds = array<i64: 32, 16>}, {pipeline_mode = #tpu.pipeline_mode<synchronous>, transform_indices = @transform_3, window_bounds = array<i64: 1, 16>}, {transform_indices = @transform_4, window_bounds = array<i64: 8, 8>}, {transform_indices = @transform_5, window_bounds = array<i64: 8, 2>}]} {
    %c0 = arith.constant 0 : index
    %c0_0 = arith.constant 0 : index
    %0 = vector.load %arg1[%c0, %c0_0] : memref<8x32xf32, #tpu.memory_space<vmem>>, vector<8x32xf32>
    %1 = arith.truncf %0 : vector<8x32xf32> to vector<8x32xbf16>
    %c0_1 = arith.constant 0 : index
    %c0_2 = arith.constant 0 : index
    %2 = vector.load %arg3[%c0_1, %c0_2] : memref<32x16xbf16, #tpu.memory_space<vmem>>, vector<32x16xbf16>
    %cst = arith.constant dense<0.000000e+00> : vector<8x16xf32>
    %3 = tpu.matmul %1, %2, %cst {dimension_numbers = #tpu.dot_dimension_numbers<[1], [0], [0], [1], [0, 0, 1, 1], [], []>} : vector<8x32xbf16>, vector<32x16xbf16>, vector<8x16xf32> -> vector<8x16xf32>
    %c0_3 = arith.constant 0 : index
    %c0_4 = arith.constant 0 : index
    %4 = vector.load %arg4[%c0_3, %c0_4] : memref<1x16xf32, #tpu.memory_space<vmem>>, vector<1x16xf32>
    %5 = vector.broadcast %4 : vector<1x16xf32> to vector<8x16xf32>
    %6 = arith.addf %3, %5 : vector<8x16xf32>
    %7 = vector.extract_strided_slice %6 {offsets = [0, 0], sizes = [8, 8], strides = [1, 1]} : vector<8x16xf32> to vector<8x8xf32>
    %8 = vector.extract_strided_slice %6 {offsets = [0, 8], sizes = [8, 8], strides = [1, 1]} : vector<8x16xf32> to vector<8x8xf32>
    %cst_5 = arith.constant 0.000000e+00 : f32
    %9 = vector.broadcast %cst_5 : f32 to vector<8x8xf32>
    %10 = arith.maximumf %8, %9 : vector<8x8xf32>
    %11 = math.absf %8 : vector<8x8xf32>
    %cst_6 = arith.constant 0.000000e+00 : f32
    %12 = vector.broadcast %cst_6 : f32 to vector<8x8xf32>
    %13 = arith.subf %12, %11 : vector<8x8xf32>
    %14 = math.exp %13 : vector<8x8xf32>
    %cst_7 = arith.constant 1.000000e+00 : f32
    %15 = vector.broadcast %cst_7 : f32 to vector<8x8xf32>
    %16 = arith.addf %15, %14 : vector<8x8xf32>
    %17 = math.log %16 : vector<8x8xf32>
    %18 = arith.addf %10, %17 : vector<8x8xf32>
    %c0_8 = arith.constant 0 : index
    %c0_9 = arith.constant 0 : index
    %19 = vector.load %arg2[%c0_8, %c0_9] : memref<8x8xf32, #tpu.memory_space<vmem>>, vector<8x8xf32>
    %20 = arith.mulf %19, %18 : vector<8x8xf32>
    %21 = arith.addf %7, %20 : vector<8x8xf32>
    %22 = tpu.iota {dimensions = array<i32: 1>} : vector<8x8xi32>
    %23 = arith.sitofp %22 : vector<8x8xi32> to vector<8x8xf32>
    %cst_10 = arith.constant 0.000000e+00 : f32
    %24 = vector.broadcast %cst_10 : f32 to vector<8x8xf32>
    %cst_11 = arith.constant dense<0xFF800000> : vector<8xf32>
    %25 = vector.multi_reduction <maximumf>, %21, %cst_11 [1] : vector<8x8xf32> to vector<8xf32>
    %26 = vector.shape_cast %25 : vector<8xf32> to vector<8x1xf32>
    %27 = vector.broadcast %26 : vector<8x1xf32> to vector<8x8xf32>
    %28 = arith.cmpf oeq, %21, %27 : vector<8x8xf32>
    %cst_12 = arith.constant 8.000000e+00 : f32
    %29 = vector.broadcast %cst_12 : f32 to vector<8x8xf32>
    %30 = arith.select %28, %23, %29 : vector<8x8xi1>, vector<8x8xf32>
    %cst_13 = arith.constant dense<0x7F800000> : vector<8xf32>
    %31 = vector.multi_reduction <minimumf>, %30, %cst_13 [1] : vector<8x8xf32> to vector<8xf32>
    %32 = vector.shape_cast %31 : vector<8xf32> to vector<8x1xf32>
    %33 = vector.broadcast %32 : vector<8x1xf32> to vector<8x8xf32>
    %34 = arith.cmpf oeq, %23, %33 : vector<8x8xf32>
    %cst_14 = arith.constant 1.000000e+00 : f32
    %35 = vector.broadcast %cst_14 : f32 to vector<8x8xf32>
    %36 = arith.select %34, %35, %24 : vector<8x8xi1>, vector<8x8xf32>
    %cst_15 = arith.constant -1.000000e+30 : f32
    %37 = vector.broadcast %cst_15 : f32 to vector<8x8xf32>
    %38 = arith.select %34, %37, %21 : vector<8x8xi1>, vector<8x8xf32>
    %cst_16 = arith.constant dense<0xFF800000> : vector<8xf32>
    %39 = vector.multi_reduction <maximumf>, %38, %cst_16 [1] : vector<8x8xf32> to vector<8xf32>
    %40 = vector.shape_cast %39 : vector<8xf32> to vector<8x1xf32>
    %41 = vector.broadcast %40 : vector<8x1xf32> to vector<8x8xf32>
    %42 = arith.cmpf oeq, %38, %41 : vector<8x8xf32>
    %cst_17 = arith.constant 8.000000e+00 : f32
    %43 = vector.broadcast %cst_17 : f32 to vector<8x8xf32>
    %44 = arith.select %42, %23, %43 : vector<8x8xi1>, vector<8x8xf32>
    %cst_18 = arith.constant dense<0x7F800000> : vector<8xf32>
    %45 = vector.multi_reduction <minimumf>, %44, %cst_18 [1] : vector<8x8xf32> to vector<8xf32>
    %46 = vector.shape_cast %45 : vector<8xf32> to vector<8x1xf32>
    %47 = vector.broadcast %46 : vector<8x1xf32> to vector<8x8xf32>
    %48 = arith.cmpf oeq, %23, %47 : vector<8x8xf32>
    %cst_19 = arith.constant 1.000000e+00 : f32
    %49 = vector.broadcast %cst_19 : f32 to vector<8x8xf32>
    %50 = arith.select %48, %49, %36 : vector<8x8xi1>, vector<8x8xf32>
    %51 = tpu.concatenate %32, %46 in 1 : vector<8x1xf32>, vector<8x1xf32> -> vector<8x2xf32>
    %52 = arith.fptosi %51 : vector<8x2xf32> to vector<8x2xi32>
    %c0_20 = arith.constant 0 : index
    %c0_21 = arith.constant 0 : index
    %53 = vector.load %arg6[%c0_20, %c0_21] : memref<8x2xi32, #tpu.memory_space<vmem>>, vector<8x2xi32>
    tpu.vector_store %arg6[%c0_20, %c0_21], %52 {strides = array<i32>} : memref<8x2xi32, #tpu.memory_space<vmem>>, vector<8x2xi32>,
    %cst_22 = arith.constant 0.000000e+00 : f32
    %54 = vector.broadcast %cst_22 : f32 to vector<8x8xf32>
    %55 = arith.cmpf ogt, %50, %54 : vector<8x8xf32>
    %cst_23 = arith.constant -1.000000e+30 : f32
    %56 = vector.broadcast %cst_23 : f32 to vector<8x8xf32>
    %57 = arith.select %55, %21, %56 : vector<8x8xi1>, vector<8x8xf32>
    %cst_24 = arith.constant dense<0xFF800000> : vector<8xf32>
    %58 = vector.multi_reduction <maximumf>, %57, %cst_24 [1] : vector<8x8xf32> to vector<8xf32>
    %59 = vector.shape_cast %58 : vector<8xf32> to vector<8x1xf32>
    %60 = vector.broadcast %59 : vector<8x1xf32> to vector<8x8xf32>
    %61 = arith.subf %57, %60 : vector<8x8xf32>
    %62 = math.exp %61 : vector<8x8xf32>
    %cst_25 = arith.constant dense<0.000000e+00> : vector<8xf32>
    %63 = vector.multi_reduction <add>, %62, %cst_25 [1] : vector<8x8xf32> to vector<8xf32>
    %64 = vector.shape_cast %63 : vector<8xf32> to vector<8x1xf32>
    %65 = tpu.reciprocal %64 {approx = true} : vector<8x1xf32> -> vector<8x1xf32>
    %66 = vector.broadcast %65 : vector<8x1xf32> to vector<8x8xf32>
    %67 = arith.mulf %62, %66 : vector<8x8xf32>
    %c0_26 = arith.constant 0 : index
    %c0_27 = arith.constant 0 : index
    %68 = vector.load %arg5[%c0_26, %c0_27] : memref<8x8xf32, #tpu.memory_space<vmem>>, vector<8x8xf32>
    tpu.vector_store %arg5[%c0_26, %c0_27], %67 {strides = array<i32>} : memref<8x8xf32, #tpu.memory_space<vmem>>, vector<8x8xf32>,
    return
  }
  func.func @transform_0(%arg0: i32) -> (i32, i32) {
    %c0_i32 = arith.constant 0 : i32
    %c0_i32_0 = arith.constant 0 : i32
    return %arg0, %c0_i32 : i32, i32
  }
  func.func @transform_1(%arg0: i32) -> (i32, i32) {
    %c0_i32 = arith.constant 0 : i32
    %c0_i32_0 = arith.constant 0 : i32
    return %arg0, %c0_i32 : i32, i32
  }
  func.func @transform_2(%arg0: i32) -> (i32, i32) {
    %c0_i32 = arith.constant 0 : i32
    %c0_i32_0 = arith.constant 0 : i32
    %c0_i32_1 = arith.constant 0 : i32
    return %c0_i32, %c0_i32_0 : i32, i32
  }
  func.func @transform_3(%arg0: i32) -> (i32, i32) {
    %c0_i32 = arith.constant 0 : i32
    %c0_i32_0 = arith.constant 0 : i32
    %c0_i32_1 = arith.constant 0 : i32
    return %c0_i32, %c0_i32_0 : i32, i32
  }
  func.func @transform_4(%arg0: i32) -> (i32, i32) {
    %c0_i32 = arith.constant 0 : i32
    %c0_i32_0 = arith.constant 0 : i32
    return %arg0, %c0_i32 : i32, i32
  }
  func.func @transform_5(%arg0: i32) -> (i32, i32) {
    %c0_i32 = arith.constant 0 : i32
    %c0_i32_0 = arith.constant 0 : i32
    return %arg0, %c0_i32 : i32, i32
  }
}

</mosaic_0001>

<bundles_post_ra>
// kernel: tpu_custom_call.1
= control target key start
LH: loop header
LB: loop body
LE: loop exit
PB: predicated region body
PF: predicated region fallthrough
CT: control target
= control target key end

     0   :  { %s564_s18 = smov 0   ;;  %s613_s0 = inlined_call_operand.vmem [shape: f32[16,32], index: 0, kind: input, shape index: {}]   ;;  %s614_s1 = inlined_call_operand.vmem [shape: f32[16,8], index: 1, kind: input, shape index: {}]   ;;  %s615_s2 = inlined_call_operand.vmem [shape: bf16[32,16], index: 2, kind: input, shape index: {}]   ;;  %s616_s3 = inlined_call_operand.vmem [shape: f32[1,16], index: 3, kind: input, shape index: {}]   ;;  %s617_s4 = inlined_call_operand.vmem [shape: f32[16,8], index: 4, kind: output, shape index: {0}]   ;;  %s618_s5 = inlined_call_operand.vmem [shape: s32[16,2], index: 5, kind: output, shape index: {1}]  }
   0x1 LB: > { %s474_s19 = sadd.s32 4294967295, %s529_s18   ;;  %p478_p0 = scmp.ge.s32.totalorder %s529_s18, 1  ;;  %s529_s18 = sphi %s564_s18, %s16_s18  }
   0x2   : > { %p198_p1 = scmp.lt.s32.totalorder %s529_s18, 3 }
   0x4   : > { %p199_p2 = pnand %p478_p0, %p198_p1 }
   0x5   : > { %p232_p3 = scmp.lt.s32.totalorder (!%p199_p2), %s474_s19, 1  ;;  %s533_s30 = smov (!%p199_p2), 120  }
   0x6   : > { %202 = sbr.rel (%p199_p2) target bundleno = 1253 (0x4e5), region = 36 }
   0xb   : > { %v513_v0 = vld [vmem:[%s615_s2 + $0x8] sm:$0xff]   ;;  %v531_v1 = vmov 0.0   ;;  %v514_v2 = vld [vmem:[%s615_s2] sm:$0xff]   ;;  %vm532_vm0 = vmmov 0   ;;  %s620_s19 = smov (!%p232_p3, %s474_s19), 1  ;;  %vm274_vm1 = vcmask 261120   ;;  %v334_v25 = vlaneseq }
   0xc   : > { %492 = vmatprep.subr.bf16.mxu0 %v531_v1  ;;  %496 = vmatprep.mubr.msk.bf16.mxu0 %vm532_vm0, %v531_v1  ;;  %s581_s24 = sshll.u32 %s620_s19, 3  ;;  %v483_v5 = vld [vmem:[%s616_s3] ss:$0 sm:$0xff]  ;;  %vm337_vm2 = vcmask 64512   ;;  %vm359_vm6 = vcmask 7168   ;;  %vm362_vm8 = vcmask 15360  }
   0xd   : > { %493 = vmatpush3.bf16.msra.mxu0 %v513_v0  ;;  %s235_s27 = scalar_lea.vmem %s613_s0, %s581_s24  ;;  %s239_s8 = scalar_lea.vmem %s614_s1, %s581_s24  ;;  %v335_v26 = vand.u32 127, %v334_v25 }
   0xe   : > { %494 = vmatprep.subr.bf16.mxu0 %v531_v1  ;;  %v249_v3 = vld [vmem:[%s235_s27] sm:$0xff]  ;;  %s247_s11 = scalar_lea.vmem %s618_s5, %s581_s24  ;;  %s243_s14 = scalar_lea.vmem %s617_s4, %s581_s24 }
   0xf   : > { %v250_v4 = vpack.c.bf16 %v249_v3, %v249_v3  ;;  %v327_v20 = vld [vmem:[%s239_s8] sm:$0xff]  ;;  %v336_v27 = vcvt.s32.f32 %v335_v26 }
  0x11   : > { %495 = vmatpush3.bf16.msra.mxu0 %v514_v2 }
  0x14   : > { %497 = vmatmul.mubr.msk.bf16.vlgmr.msra.gmra.mxu0 %vm274_vm1, %v250_v4 }
  0xd4   : > { %v312_v6 = vpop.f32.mrf.mxu0 }
  0xd5   : > { %v313_v7 = vadd.f32 %v483_v5, %v312_v6 }
  0xd6   : > { %v498_v8 = vpop.f32.mrf.mxu0 }
  0xd7   : > { %v319_v9 = vand.u32 2147483647, %v313_v7  ;;  %v318_v17 = vmax.f32 %v313_v7, 0.0 }
  0xd8   : > { %v315_v10 = vpop.f32.mrf.mxu0 }
  0xd9   : > { %v320_v11 = vsub.f32 0.0, %v319_v9 }
  0xda   : > { %v499_v12 = vpop.f32.mrf.mxu0 }
  0xdb   : > { %v321_v13 = vmul.f32 1.442695, %v320_v11 }
  0xdd   : > { %515 = vpow2.f32 %v321_v13 }
  0xea   : > { %v516_v14 = vpop.eup %515 }
  0xeb   : > { %v323_v15 = vadd.f32 1.0, %v516_v14 }
  0xed   : > { %517 = vlog2.f32 %v323_v15 }
  0xfa   : > { %v518_v16 = vpop.eup %517 }
  0xfb   : > { %v325_v18 = vmul.f32 0.6931472, %v518_v16 }
  0xfd   : > { %v326_v19 = vadd.f32 %v325_v18, %v318_v17 }
  0xff   : > { %329 = vrot.lane.b32.xlu0 %v326_v19, %s533_s30 }
 0x171   : > { %v330_v21 = vpop.permute.xlu0 %329 }
 0x172   : > { %v332_v22 = vmul.f32 %v330_v21, %v327_v20 }
 0x174   : > { %v333_v23 = vadd.f32 %v332_v22, %v313_v7 }
 0x176   : > { %v338_v24 = vsel %vm337_vm2, %v333_v23, -inf }
 0x177   : > { %339 = vmax.xlane.f32.xlu0 %v338_v24 }
 0x200   : > { %v340_v28 = vpop.xlane.xlu0 %339 }
 0x201   : > { %vm341_vm3 = vcmp.eq.f32.partialorder %v333_v23, %v340_v28 }
 0x202   : > { %v342_v29 = vsel %vm341_vm3, %v336_v27, 8.0 }
 0x203   : > { %v343_v30 = vsel %vm337_vm2, %v342_v29, inf }
 0x204   : > { %344 = vmin.xlane.f32.xlu1 %v343_v30 }
 0x28d   : > { %v345_v31 = vpop.xlane.xlu1 %344 }
 0x28e   : > { %vm346_vm4 = vcmp.eq.f32.partialorder %v336_v27, %v345_v31 }
 0x28f   : > { %v348_v32 = vsel %vm346_vm4, -1e+30, %v333_v23  ;;  %v347_v38 = vsel %vm346_vm4, 1.0, %v531_v1 }
 0x290   : > { %v349_v33 = vsel %vm337_vm2, %v348_v32, -inf }
 0x291   : > { %350 = vmax.xlane.f32.xlu1 %v349_v33 }
 0x31a   : > { %v351_v34 = vpop.xlane.xlu1 %350 }
 0x31b   : > { %vm352_vm5 = vcmp.eq.f32.partialorder %v348_v32, %v351_v34 }
 0x31c   : > { %v353_v35 = vsel %vm352_vm5, %v336_v27, 8.0 }
 0x31d   : > { %v354_v36 = vsel %vm337_vm2, %v353_v35, inf }
 0x31e   : > { %355 = vmin.xlane.f32.xlu1 %v354_v36 }
 0x3a7   : > { %v356_v37 = vpop.xlane.xlu1 %355 }
 0x3a8   : > { %vm357_vm7 = vcmp.eq.f32.partialorder %v336_v27, %v356_v37  ;;  %v360_v39 = vsel %vm359_vm6, %v345_v31, %v356_v37 }
 0x3a9   : > { %v500_v40 = vtrunc.f32 %v360_v39  ;;  %v358_v41 = vsel %vm357_vm7, 1.0, %v347_v38 }
 0x3aa   : > { %vm364_vm9 = vcmp.gt.f32.partialorder %v358_v41, 0.0 }
 0x3ab   : > { %v501_v42 = vcvt.f32.s32 %v500_v40  ;;  %v365_v43 = vsel %vm364_vm9, %v333_v23, -1e+30 }
 0x3ac   : > { %v366_v44 = vsel %vm337_vm2, %v365_v43, -inf }
 0x3ad   : > { %363 = vst.msk [vmem:[%s247_s11] sm:$0xff] %vm362_vm8, %v501_v42  ;;  %367 = vmax.xlane.f32.xlu1 %v366_v44 }
 0x436   : > { %v368_v45 = vpop.xlane.xlu1 %367 }
 0x437   : > { %v369_v46 = vsub.f32 %v365_v43, %v368_v45 }
 0x439   : > { %v370_v47 = vmul.f32 1.442695, %v369_v46 }
 0x43b   : > { %519 = vpow2.f32 %v370_v47 }
 0x448   : > { %v520_v48 = vpop.eup %519 }
 0x449   : > { %v372_v49 = vsel %vm337_vm2, %v520_v48, 0.0 }
 0x44a   : > { %373 = vadd.xlane.f32.xlu1 %v372_v49 }
 0x4d3   : > { %v374_v50 = vpop.xlane.xlu1 %373 }
 0x4d4   : > { %521 = vrcp.f32 %v374_v50 }
 0x4e1   : > { %v522_v51 = vpop.eup %521 }
 0x4e2   : > { %v376_v52 = vmul.f32 %v522_v51, %v520_v48 }
 0x4e4   : > { %377 = vst.msk [vmem:[%s243_s14] sm:$0xff] %vm337_vm2, %v376_v52 }
 0x4e5 PF: > { %s16_s18 = sadd.s32 1, %s529_s18  }
 0x4e6   : > { %p13_p4 = scmp.ge.s32.totalorder %s16_s18, 4  }
 0x4e8   :  { %15 = sbr.rel (!%p13_p4) target bundleno = 1 (0x1), region = 81 }

</bundles_post_ra>
